<compile_context>
chip_gen: v7x
topology: tpu7x:2x2x1
jax: 0.10.0
libtpu: 0.0.40
codegen_flags: <defaults>
</compile_context>

<pallas_src>
import numpy as np
import jax
import jax.numpy as jnp
from jax.experimental import pallas as pl
from jax.experimental.pallas import tpu as pltpu

_LANE = 128
_TARGET_BLOCK_BYTES = 2 * 1024 * 1024   # ~2 MiB blocks; double-buffered in+out ~ 8 MiB


def _sd_kernel(scale_ref, x_ref, o_ref):
    # scale_ref: (TB, 1) f32; x_ref / o_ref: (TB, TL) in the input dtype.
    o_ref[...] = x_ref[...] * scale_ref[...].astype(o_ref.dtype)


def _choose_tiles(n, l, itemsize):
    """Pick (TB, TL): lane-dense, ~_TARGET_BLOCK_BYTES, >= 4 blocks if possible."""
    sublane = 8 * max(1, 4 // itemsize)          # 8 for f32, 16 for bf16, 32 for int8
    if l <= _LANE:
        tl = l                                   # full (possibly ragged) row: single lane tile
    else:
        max_tl = max(_LANE,
                     (_TARGET_BLOCK_BYTES // (sublane * itemsize) // _LANE) * _LANE)
        tl = min((l // _LANE) * _LANE, max_tl)   # multiple of 128; ragged edge block is masked
    tb = max(1, _TARGET_BLOCK_BYTES // max(1, tl * itemsize))
    if tb >= n:
        tb = n                                   # full batch dim is always a legal block dim
    else:
        tb = max(sublane, (tb // sublane) * sublane)
        tb = min(tb, n)
    # Keep >= 4 blocks when the tensor allows it (v7x has 2 TensorCores).
    while pl.cdiv(n, tb) * pl.cdiv(l, tl) < 4:
        if tb >= 2 * sublane:
            tb = max(sublane, ((tb // 2) // sublane) * sublane)
        elif tl >= 2 * _LANE:
            tl = max(_LANE, ((tl // 2) // _LANE) * _LANE)
        else:
            break
    return tb, tl


def _row_scale(key, n, p, mode):
    """Per-row scale keep/(1-p) as an f32 (N, 1) column."""
    survival = 1.0 - p
    if mode == "row":
        keep = jax.random.bernoulli(key, survival, (n,))
    else:  # "batch": one draw shared by every row
        keep = jnp.broadcast_to(jax.random.bernoulli(key, survival, (1,)), (n,))
    return (keep.astype(jnp.float32) / survival).reshape(n, 1)


def stochastic_depth(x, p, mode, key, training=True):
    if p < 0.0 or p > 1.0:
        raise ValueError(
            "drop probability has to be between 0 and 1, but got {}".format(p))
    if mode not in ("batch", "row"):
        raise ValueError(
            "mode has to be either 'batch' or 'row', but got {}".format(mode))
    if not training or p == 0.0:
        return x
    if p == 1.0:
        # TODO(synk): PyTorch reference yields NaN here (0/0); we return the
        # intended "drop everything" result instead.
        return jnp.zeros_like(x)

    n = x.shape[0]
    l = int(np.prod(x.shape[1:])) if x.ndim > 1 else 1
    itemsize = jnp.dtype(x.dtype).itemsize
    scale = _row_scale(key, n, p, mode)

    tb, tl = _choose_tiles(n, l, itemsize)
    x2 = x.reshape(n, l)                         # free view; no padding copy

    out = pl.pallas_call(
        _sd_kernel,
        out_shape=jax.ShapeDtypeStruct((n, l), x.dtype),
        grid_spec=pltpu.PrefetchScalarGridSpec(
            num_scalar_prefetch=0,
            grid=(pl.cdiv(n, tb), pl.cdiv(l, tl)),
            in_specs=[pl.BlockSpec((tb, 1), lambda b, t: (b, 0)),
                      pl.BlockSpec((tb, tl), lambda b, t: (b, t))],
            out_specs=pl.BlockSpec((tb, tl), lambda b, t: (b, t)),
        ),
        compiler_params=pltpu.CompilerParams(
            dimension_semantics=("parallel", "parallel")),
        cost_estimate=pl.CostEstimate(
            flops=n * l,
            transcendentals=0,
            bytes_accessed=2 * n * l * itemsize + n * 4),
    )(scale, x2)

    return out.reshape(x.shape)


class StochasticDepth:
    """Mirror of the PyTorch module; `training` toggles the identity path."""

    def __init__(self, p, mode):
        self.p = p
        self.mode = mode
        self.training = True

    def __call__(self, x, key):
        return stochastic_depth(x, self.p, self.mode, key, self.training)

    def __repr__(self):
        return "StochasticDepth(p={}, mode={})".format(self.p, self.mode)


if __name__ == "__main__":
    key = jax.random.PRNGKey(0)
    k_x, k_row, k_batch, k_rag, k_multi = jax.random.split(key, 5)

    # --- row mode, 4-D f32 input --------------------------------------------
    N, p = 2, 0.25
    x = jax.random.normal(k_x, (N, 4, 16, 16), jnp.float32)
    y = jax.block_until_ready(stochastic_depth(x, p, "row", k_row, training=True))
    scale = _row_scale(k_row, N, p, "row")
    y_ref = x * scale.reshape(N, 1, 1, 1)
    assert y.shape == x.shape
    assert jnp.allclose(y, y_ref, atol=1e-6, rtol=1e-6)

    # --- batch mode, bf16, trailing size not a multiple of 128 ---------------
    xb = jax.random.normal(k_x, (3, 5, 7), jnp.float32).astype(jnp.bfloat16)
    pb = 0.4
    yb = jax.block_until_ready(stochastic_depth(xb, pb, "batch", k_batch))
    scale_b = _row_scale(k_batch, 3, pb, "batch")
    yb_ref = xb * scale_b.astype(xb.dtype).reshape(3, 1, 1)
    assert yb.shape == xb.shape
    assert jnp.allclose(yb.astype(jnp.float32), yb_ref.astype(jnp.float32),
                        atol=1e-2, rtol=1e-2)

    # --- row mode, ragged L > 128 (masked edge block, no pad/slice) ----------
    xr = jax.random.normal(k_rag, (4, 200), jnp.float32)
    pr = 0.5
    yr = jax.block_until_ready(stochastic_depth(xr, pr, "row", k_rag))
    scale_r = _row_scale(k_rag, 4, pr, "row")
    yr_ref = xr * scale_r
    assert jnp.allclose(yr, yr_ref, atol=1e-6, rtol=1e-6)

    # --- row mode, multi-row blocks (TB < N, TB multiple of sublane) ---------
    xm = jax.random.normal(k_multi, (32, 384), jnp.float32)
    pm = 0.3
    ym = jax.block_until_ready(stochastic_depth(xm, pm, "row", k_multi))
    scale_m = _row_scale(k_multi, 32, pm, "row")
    ym_ref = xm * scale_m
    assert jnp.allclose(ym, ym_ref, atol=1e-6, rtol=1e-6)

    # --- identity fast paths --------------------------------------------------
    assert jnp.array_equal(stochastic_depth(x, 0.5, "row", k_row, training=False), x)
    assert jnp.array_equal(stochastic_depth(x, 0.0, "row", k_row, training=True), x)

    print("KERNEL_OK")
</pallas_src>

<mosaic_0001>
module attributes {stable_mosaic.version = 11 : i64} {
  func.func @_sd_kernel(%arg0: i32, %arg1: i32, %arg2: memref<2x1xf32, #tpu.memory_space<vmem>>, %arg3: memref<2x256xf32, #tpu.memory_space<vmem>>, %arg4: memref<2x256xf32, #tpu.memory_space<vmem>>) attributes {dimension_semantics = [#tpu.dimension_semantics<parallel>, #tpu.dimension_semantics<parallel>], iteration_bounds = array<i64: 1, 4>, scalar_prefetch = 0 : i64, scratch_operands = 0 : i64, tpu.core_type = #tpu.core_type<tc>, window_params = [{transform_indices = @transform_0, window_bounds = array<i64: 2, 1>}, {transform_indices = @transform_1, window_bounds = array<i64: 2, 256>}, {transform_indices = @transform_2, window_bounds = array<i64: 2, 256>}]} {
    %c0 = arith.constant 0 : index
    %c0_0 = arith.constant 0 : index
    %0 = vector.load %arg3[%c0, %c0_0] : memref<2x256xf32, #tpu.memory_space<vmem>>, vector<2x256xf32>
    %c0_1 = arith.constant 0 : index
    %c0_2 = arith.constant 0 : index
    %1 = vector.load %arg2[%c0_1, %c0_2] : memref<2x1xf32, #tpu.memory_space<vmem>>, vector<2x1xf32>
    %2 = vector.broadcast %1 : vector<2x1xf32> to vector<2x256xf32>
    %3 = arith.mulf %0, %2 : vector<2x256xf32>
    %c0_3 = arith.constant 0 : index
    %c0_4 = arith.constant 0 : index
    %4 = vector.load %arg4[%c0_3, %c0_4] : memref<2x256xf32, #tpu.memory_space<vmem>>, vector<2x256xf32>
    tpu.vector_store %arg4[%c0_3, %c0_4], %3 {strides = array<i32>} : memref<2x256xf32, #tpu.memory_space<vmem>>, vector<2x256xf32>,
    return
  }
  func.func @transform_0(%arg0: i32, %arg1: i32) -> (i32, i32) {
    %c0_i32 = arith.constant 0 : i32
    %c0_i32_0 = arith.constant 0 : i32
    return %arg0, %c0_i32 : i32, i32
  }
  func.func @transform_1(%arg0: i32, %arg1: i32) -> (i32, i32) {
    %c0_i32 = arith.constant 0 : i32
    return %arg0, %arg1 : i32, i32
  }
  func.func @transform_2(%arg0: i32, %arg1: i32) -> (i32, i32) {
    %c0_i32 = arith.constant 0 : i32
    return %arg0, %arg1 : i32, i32
  }
}

</mosaic_0001>

<bundles_post_ra>
// kernel: tpu_custom_call.1
= control target key start
LH: loop header
LB: loop body
LE: loop exit
PB: predicated region body
PF: predicated region fallthrough
CT: control target
= control target key end

     0   :  { %7 = vsyncpa [#allocation3], 0  ;;  %s718_s0 = inlined_call_operand.vmem [shape: f32[2,1], index: 0, kind: input, shape index: {}]   ;;  %s719_s1 = inlined_call_operand.hbm [shape: f32[2,1024], index: 1, kind: input, shape index: {}]   ;;  %s720_s2 = inlined_call_operand.hbm [shape: f32[2,1024], index: 2, kind: output, shape index: {}]  }
   0x1   :  { %9 = vsyncpa [#allocation3 + $0x1], 0 }
   0x2   :  { %10 = vsyncpa [#allocation4], 0 }
   0x3   :  { %12 = vsyncpa [#allocation4 + $0x1], 0  ;;  %s545_s9 = smov 0   ;;  %s547_s10 = smov 0  }
   0x4   :  { %s549_s11 = smov 0   ;;  %s551_s12 = smov 0  }
   0x5   :  { %s553_s13 = smov 0   ;;  %s555_s14 = smov 0  }
   0x6 LB: > { %s329_s15 = sadd.s32 4294967295, %s524_s14   ;;  %s330_s16 = sadd.s32 4294967294, %s524_s14   ;;  %s524_s14 = sphi %s555_s14, %s18_s14   ;;  %s520_s13 = sphi %s553_s13, %s735_s13   ;;  %s516_s12 = sphi %s551_s12, %s734_s12   ;;  %s512_s11 = sphi %s549_s11, %s733_s11   ;;  %s508_s10 = sphi %s547_s10, %s732_s10   ;;  %s504_s9 = sphi %s545_s9, %s731_s9  }
   0x7   : > { %s27_s17 = sadd.s32 1, %s520_s13  ;;  %s65_s18 = sadd.s32 1, %s512_s11 }
   0x8   : > { %p28_p0 = scmp.ge.s32.totalorder %s27_s17, 4  ;;  %p72_p1 = scmp.ne.s32.totalorder %s512_s11, %s508_s10 }
   0x9   : > { %p73_p2 = scmp.eq.s32.totalorder %s524_s14, 0  ;;  %p78_p3 = scmp.ne.s32.totalorder %s508_s10, %s504_s9 }
   0xa   : > { %s737_s17 = smov (%p28_p0, %s27_s17), 0  ;;  %p79_p5 = scmp.eq.s32.totalorder %s329_s15, 0 }
   0xb   : > { %p586_p4 = por %p73_p2, %p72_p1  ;;  %s61_s20 = ssub.s32 %s520_s13, %s737_s17 }
   0xc   : > { %p104_p6 = scmp.eq.s32.totalorder %s329_s15, 3  ;;  %p63_p7 = scmp.eq.s32.totalorder %s61_s20, 0 }
   0xd   : > { %p592_p8 = por %p79_p5, %p78_p3  ;;  %p110_p10 = scmp.eq.s32.totalorder %s330_s16, 3 }
   0xe   : > { %p596_p9 = por %p104_p6, %p72_p1  ;;  %p359_p12 = scmp.lt.s32.totalorder %s524_s14, 4 }
   0xf   : > { %s601_s23 = scalar_select %p63_p7, %s512_s11, %s65_s18  }
  0x10   : > { %s724_s22 = scalar_select %p596_p9, 1, 0 }
  0x11   : > { %p603_p11 = por %p110_p10, %p78_p3  ;;  %s137_s25 = sand.u32 1, %s512_s11  }
  0x12   : > { %s334_s26 = sshll.u32 %s137_s25, 2  ;;  %s345_s27 = sshll.u32 %s520_s13, 6 }
  0x13   : > { %s725_s24 = scalar_select %p603_p11, 1, 0 }
  0x14   : > { %s613_s30 = scalar_lea.hbm %s719_s1, %s345_s27  ;;  %s141_s3 = scalar_lea.vmem [#allocation2], %s334_s26 }
  0x15   : > { %s151_s4 = sshll.u32 %s141_s3, 4  ;;  %p619_p13 = pnand %p359_p12, %p586_p4  ;;  %s615_s4 = int_to_ptr.vmem [resolvable:$true] %s151_s4 }
  0x16   : > { %s138_s6 = scalar_lea.sflag [#allocation3], %s137_s25  ;;  %s412_s7 = scalar_lea.hbm %s613_s30, 64 }
  0x17   : > { %p413_p2 = scmp.ne.s32.totalorder %s613_s30, %s412_s7  ;;  %p414_p3 = pneg %p619_p13 }
  0x18   : > { %s417_s16 = scalar_lea.hbm %s719_s1, 256  ;;  %p418_p4 = scmp.lt.u32.totalorder %s613_s30, %s719_s1 }
  0x19   : > { %p415_p5 = pnand %p414_p3, %p413_p2  ;;  %p419_p7 = scmp.lt.u32.totalorder %s417_s16, %s412_s7 }
  0x1a   : > { %p421_p12 = scmp.lt.u32.totalorder %s412_s7, %s613_s30 }
  0x1b   : > { %p416_p6 = pneg %p415_p5  ;;  %p420_p10 = por %p419_p7, %p418_p4 }
  0x1d   : > { %p422_p0 = por %p421_p12, %p420_p10 }
  0x1f   : > { %p423_p1 = pnand %p422_p0, %p416_p6 }
  0x21   : > { %426 = shalt.err (!%p423_p1)
}
  0x22   : > { %s427_s20 = scalar_lea.vmem %s615_s4, 64  ;;  %s526_s25 = smov [#allocation2]  }
  0x23   : > { %p428_p2 = scmp.ne.s32.totalorder %s615_s4, %s427_s20  ;;  %s432_s26 = sshll.u32 %s526_s25, 4  ;;  %s433_s26 = int_to_ptr.vmem [resolvable:$false] %s432_s26 }
  0x24   : > { %s434_s27 = scalar_lea.vmem %s433_s26, 128  ;;  %p435_p9 = scmp.lt.s32.totalorder %s615_s4, %s433_s26 }
  0x25   : > { %p430_p5 = pnand %p428_p2, %p414_p3  ;;  %p436_p4 = scmp.lt.s32.totalorder %s434_s27, %s427_s20 }
  0x27   : > { %p431_p11 = pneg %p430_p5  ;;  %p437_p7 = por %p436_p4, %p435_p9 }
  0x29   : > { %p438_p10 = pnand %p437_p7, %p431_p11 }
  0x2b   : > { %441 = shalt.err (!%p438_p10)
}
  0x2c   : > { %354 = dma.hbm_to_vmem [thread:$0]  (!%p619_p13), %s613_s30, 64, %s615_s4, %s138_s6  }
  0x2d   : > { %p727_p0 = scmp.lt.s32.totalorder %s524_s14, 5  ;;  %p728_p1 = scmp.ge.s32.totalorder %s524_s14, 1 }
  0x2f   : > { %p157_p3 = pnand %p728_p1, %p727_p0 }
  0x30   : > { %s655_s28 = sand.u32 (!%p157_p3), 1, %s508_s10  }
  0x31   : > { %160 = sbr.rel (%p157_p3) target bundleno = 205 (0xcd), region = 28  ;;  %s338_s29 = sshll.u32 (!%p157_p3), %s655_s28, 2 }
  0x32   : > { %s163_s3 = scalar_lea.sflag (!%p157_p3), [#allocation3], %s655_s28  ;;  %s166_s7 = scalar_lea.vmem (!%p157_p3), [#allocation2], %s338_s29 }
  0x38   : > { %495 = dma.done.wait (%p592_p8), %s163_s3, 64  }
  0x39   : > { %497 = vsyncadd (%p592_p8), %s163_s3, 4294967232  ;;  %v527_v0 = vmov 0   ;;  %v198_v1 = vld [vmem:[%s718_s0] sm:$0x3]  ;;  %v528_v2 = vmov 269488144   ;;  %v206_v4 = vlaneseq }
  0x3a   : > { %411 = vset.pattern.permute.xlu0 %v527_v0  ;;  %v204_v3 = vunpack.c.l.s4 %v528_v2  ;;  %v197_v9 = vld [vmem:[%s166_s7] sm:$0xf]  ;;  %s346_s21 = sshll.u32 %s516_s12, 6  ;;  %s190_s5 = scalar_lea.vmem [#allocation5], %s338_s29 }
  0x3b   : > { %201 = vperm.xlu0 %411, %v198_v1   ;;  %v207_v6 = vshrl.u32 %v206_v4, 7  ;;  %s230_s6 = sshll.u32 %s190_s5, 4  ;;  %s670_s16 = scalar_lea.hbm %s720_s2, %s346_s21  ;;  %s672_s6 = int_to_ptr.vmem [resolvable:$true] %s230_s6 }
  0x3c   : > { %v205_v5 = vunpack.c.0.s8 %v204_v3  ;;  %s214_s18 = scalar_lea.sflag [#allocation4], %s655_s28  ;;  %s442_s19 = scalar_lea.vmem %s672_s6, 64 }
  0x3d   : > { %p443_p8 = scmp.ne.s32.totalorder %s672_s6, %s442_s19  ;;  %p729_p9 = scmp.ne.s32.totalorder %s724_s22, 0 }
  0x3e   : > { %v208_v7 = vsub.s32 %v205_v5, %v207_v6  ;;  %s529_s12 = smov [#allocation5]  }
  0x3f   : > { %p444_p11 = pnand %p443_p8, %p729_p9  ;;  %s446_s20 = sshll.u32 %s529_s12, 4  ;;  %s447_s20 = int_to_ptr.vmem [resolvable:$false] %s446_s20 }
  0x40   : > { %s448_s25 = scalar_lea.vmem %s447_s20, 128  ;;  %p449_p6 = scmp.lt.s32.totalorder %s672_s6, %s447_s20 }
  0x41   : > { %p445_p13 = pneg %p444_p11  ;;  %p450_p12 = scmp.lt.s32.totalorder %s448_s25, %s442_s19 }
  0x43   : > { %p451_p2 = por %p450_p12, %p449_p6 }
  0x45   : > { %p452_p5 = pnand %p451_p2, %p445_p13 }
  0xba   : > { %v202_v8 = vpop.permute.xlu0 %201 }
  0xbb   : > { %v209_v10 = vrot.slane %v202_v8, %v208_v7 }
  0xbd   : > { %v211_v11 = vmul.f32 %v209_v10, %v197_v9 }
  0xbf   : > { %212 = vst [vmem:[%s190_s5] sm:$0xf] %v211_v11 }
  0xc0   : > { %455 = shalt.err (!%p452_p5)
}
  0xc1   : > { %s456_s26 = scalar_lea.hbm %s670_s16, 64  ;;  %s460_s29 = scalar_lea.hbm %s720_s2, 256 }
  0xc2   : > { %p457_p4 = scmp.ne.s32.totalorder %s670_s16, %s456_s26  ;;  %p461_p0 = scmp.lt.u32.totalorder %s670_s16, %s720_s2 }
  0xc3   : > { %p462_p1 = scmp.lt.u32.totalorder %s460_s29, %s456_s26  ;;  %p464_p8 = scmp.lt.u32.totalorder %s456_s26, %s670_s16 }
  0xc4   : > { %p458_p7 = pnand %p457_p4, %p729_p9 }
  0xc5   : > { %p463_p3 = por %p462_p1, %p461_p0 }
  0xc6   : > { %p459_p10 = pneg %p458_p7 }
  0xc7   : > { %p465_p11 = por %p464_p8, %p463_p3 }
  0xc9   : > { %p466_p13 = pnand %p465_p11, %p459_p10 }
  0xcb   : > { %469 = shalt.err (!%p466_p13)
}
  0xcc   : > { %349 = dma.vmem_to_hbm [thread:$0]  (%p729_p9), %s672_s6, 64, %s670_s16, %s214_s18  }
  0xcd PF: > { %p360_p6 = scmp.ge.s32.totalorder %s524_s14, 2  ;;  %s242_s30 = sand.u32 1, %s504_s9  }
  0xce   : > { %p730_p12 = scmp.ne.s32.totalorder %s725_s24, 0  ;;  %s243_s4 = scalar_lea.sflag [#allocation4], %s242_s30 }
  0xd0   : > { %p356_p2 = pnand %p360_p6, %p730_p12 }
  0xd2   : > { %499 = dma.done.wait (!%p356_p2), %s243_s4, 64  }
  0xd3   : > { %501 = vsyncadd (!%p356_p2), %s243_s4, 4294967232  ;;  %s18_s14 = sadd.s32 1, %s524_s14   ;;  %s731_s9 = smov %s508_s10 }
  0xd4   : > { %p15_p5 = scmp.ge.s32.totalorder %s18_s14, 6   ;;  %s732_s10 = smov %s512_s11 }
  0xd5   : > { %s733_s11 = smov %s601_s23  ;;  %s734_s12 = smov %s520_s13 }
  0xd6   : > { %s735_s13 = smov %s737_s17  ;;  %17 = sbr.rel (!%p15_p5) target bundleno = 6 (0x6), region = 76 }
  0xdd   :  { %248 = vsyncpa [#allocation3], 1 }
  0xde   :  { %250 = vsyncpa [#allocation3 + $0x1], 1 }
  0xdf   :  { %251 = vsyncpa [#allocation4], 1 }
  0xe0   :  { %253 = vsyncpa [#allocation4 + $0x1], 1 }

</bundles_post_ra>
